<compile_context>
chip_gen: v6e
topology: v6e:2x2x1
jax: 0.10.0
libtpu: 0.0.40
codegen_flags: <defaults>
</compile_context>

<pallas_src>
import functools

import jax
import jax.numpy as jnp
from jax.experimental import pallas as pl
from jax.experimental.pallas import tpu as pltpu


def _round_up(x, mult):
    return ((x + mult - 1) // mult) * mult


def _pick_tile(dim, max_tile, align, max_waste=0.08):
    """Largest tile (multiple of `align`, <= max_tile) with bounded padding waste."""
    max_tile = max(align, min(max_tile, _round_up(dim, align)))
    candidates = list(range(max_tile, align - 1, -align))
    for t in candidates:                      # descending: prefer the largest tile
        pad = _round_up(dim, t)
        if (pad - dim) / dim <= max_waste:
            return t
    # No candidate meets the waste bound (tiny dims): take the least-padding one.
    return min(candidates, key=lambda t: _round_up(dim, t))


def _vmem_tile_bytes(rows, cols, itemsize):
    # VMEM footprint of a (rows, cols) tile: sublanes pad to 8, lanes pad to 128.
    return _round_up(rows, 8) * _round_up(cols, 128) * itemsize


def mf_forward_kernel(u_ref, vt_ref, o_ref, *, tn, v_resident):
    # u_ref : (tm, k_pad)   augmented U tile (biases folded into trailing columns)
    # vt_ref: (k_pad, n_pad) resident V^T  OR  (k_pad, tn) tiled V^T
    # o_ref : (tm, tn)
    if v_resident:
        j = pl.program_id(1)
        start = pl.multiple_of(j * tn, 128)
        vt = vt_ref[:, pl.ds(start, tn)]      # lane-aligned slice of resident V^T
    else:
        vt = vt_ref[...]
    acc = jnp.dot(u_ref[...], vt, preferred_element_type=jnp.float32)
    o_ref[...] = acc.astype(o_ref.dtype)


def mf_forward(b, b_u, b_v, U, V, *, tm=512, tn=2048, out_dtype=jnp.float32,
               v_resident_cap_bytes=16 << 20, total_vmem_cap_bytes=40 << 20):
    """b + b_u[:, None] + b_v[None, :] + U @ V.T via a tiled Pallas TPU kernel."""
    m, k = U.shape
    n, k2 = V.shape
    assert k == k2
    f32 = jnp.float32

    # ---- tile selection: lane-dense output, bounded padding waste --------------
    tm_eff = _pick_tile(m, tm, 8)
    tn_eff = _pick_tile(n, tn, 128)

    # Keep >= 2 grid steps along m when possible so both v7x TensorCores get work.
    m_align = _round_up(m, 8)
    if tm_eff >= m_align and m_align >= 16:
        tm_eff = _round_up((m_align + 1) // 2, 8)

    m_pad = _round_up(m, tm_eff)
    n_pad = _round_up(n, tn_eff)

    # ---- fold biases into the matmul: U_aug @ Vt_aug ---------------------------
    # U_aug[:, :k] = U, col k = b_u + b, col k+1 = 1
    # Vt_aug[:k, :] = V^T, row k = 1,      row k+1 = b_v
    k_pad = _round_up(k + 2, 8)

    U_aug = jnp.zeros((m_pad, k_pad), f32)
    U_aug = U_aug.at[:m, :k].set(U.astype(f32))
    U_aug = U_aug.at[:m, k].set(b_u.astype(f32) + jnp.asarray(b, f32))
    U_aug = U_aug.at[:m, k + 1].set(1.0)

    Vt_aug = jnp.zeros((k_pad, n_pad), f32)
    Vt_aug = Vt_aug.at[:k, :n].set(V.astype(f32).T)
    Vt_aug = Vt_aug.at[k, :n].set(1.0)
    Vt_aug = Vt_aug.at[k + 1, :n].set(b_v.astype(f32))

    # ---- VMEM accounting & resident-V decision ---------------------------------
    out_itemsize = jnp.dtype(out_dtype).itemsize
    out_bytes = 2 * _vmem_tile_bytes(tm_eff, tn_eff, out_itemsize)   # double-buffered
    u_bytes = 2 * _vmem_tile_bytes(tm_eff, k_pad, 4)                 # double-buffered
    v_resident_bytes = 1 * _vmem_tile_bytes(k_pad, n_pad, 4)         # Buffered(1)
    v_tiled_bytes = 2 * _vmem_tile_bytes(k_pad, tn_eff, 4)

    v_resident = (v_resident_bytes <= v_resident_cap_bytes and
                  out_bytes + u_bytes + v_resident_bytes <= total_vmem_cap_bytes)

    if v_resident:
        vt_spec = pl.BlockSpec((k_pad, n_pad), lambda i, j: (0, 0),
                               pipeline_mode=pl.Buffered(1))
        v_bytes = v_resident_bytes
    else:
        vt_spec = pl.BlockSpec((k_pad, tn_eff), lambda i, j: (0, j))
        v_bytes = v_tiled_bytes

    used_bytes = out_bytes + u_bytes + v_bytes
    # Explicit scoped-VMEM limit: enough headroom over our estimate, but kept well
    # below v7x's 64 MiB physical VMEM (also fine on v5e/v6e's 128 MiB).
    vmem_limit = int(min(56 << 20, max(32 << 20, int(used_bytes * 1.25) + (2 << 20))))

    grid = (m_pad // tm_eff, n_pad // tn_eff)

    out = pl.pallas_call(
        functools.partial(mf_forward_kernel, tn=tn_eff, v_resident=v_resident),
        out_shape=jax.ShapeDtypeStruct((m_pad, n_pad), out_dtype),
        grid_spec=pl.GridSpec(
            grid=grid,
            in_specs=[
                pl.BlockSpec((tm_eff, k_pad), lambda i, j: (i, 0)),   # U_aug tile
                vt_spec,                                              # V^T (resident/tiled)
            ],
            out_specs=pl.BlockSpec((tm_eff, tn_eff), lambda i, j: (i, j)),
        ),
        compiler_params=pltpu.CompilerParams(
            dimension_semantics=("parallel", "parallel"),
            vmem_limit_bytes=vmem_limit),
    )(U_aug, Vt_aug)
    return out[:m, :n]


def build_params(key, m, n, k):
    """Deterministically build parameters the same way Netflix_MF_Adam.__init__ does."""
    k_x, k_mask, k_u, k_v = jax.random.split(key, 4)

    # Synthetic ratings matrix with missing entries marked as NaN (like the Netflix data).
    ratings = jax.random.uniform(k_x, (m, n), minval=1.0, maxval=5.0, dtype=jnp.float32)
    mask = jax.random.uniform(k_mask, (m, n)) < 0.8  # observed entries
    X_train = jnp.where(mask, ratings, jnp.nan)

    # Factor matrices: randn * 0.02 (as in the PyTorch module).
    U = 0.02 * jax.random.normal(k_u, (m, k), dtype=jnp.float32)
    V = 0.02 * jax.random.normal(k_v, (n, k), dtype=jnp.float32)

    # Bias terms from nan-means of the training matrix.
    mean_value = jnp.nanmean(X_train)
    user_means = jnp.nanmean(X_train, axis=1)
    item_means = jnp.nanmean(X_train, axis=0)
    b = mean_value.astype(jnp.float32)
    b_u = (user_means - mean_value).astype(jnp.float32)
    b_v = (item_means - mean_value).astype(jnp.float32)
    return b, b_u, b_v, U, V


# TODO(synk): training pieces (masked MSE/MAE/Huber loss, L2 reg, Adam step) are not
# part of forward() and are not implemented here.

if __name__ == "__main__":
    # Small, non-tile-multiple shapes to also exercise the pad/slice path.
    m, n, k = 300, 1000, 32
    b, b_u, b_v, U, V = build_params(jax.random.PRNGKey(0), m, n, k)

    pred = mf_forward(b, b_u, b_v, U, V)
    pred = jax.block_until_ready(pred)

    # Pure-JAX reference of the module's forward().
    ref = b + b_u[:, None] + b_v[None, :] + U @ V.T
    assert pred.shape == (m, n)
    assert jnp.allclose(pred, ref, atol=1e-4, rtol=1e-4), "mismatch vs reference forward"

    print("KERNEL_OK")
</pallas_src>

<mosaic_0001>
module attributes {stable_mosaic.version = 11 : i64} {
  func.func @mf_forward_kernel(%arg0: i32, %arg1: i32, %arg2: memref<152x40xf32, #tpu.memory_space<vmem>>, %arg3: memref<40x1024xf32, #tpu.memory_space<vmem>>, %arg4: memref<152x1024xf32, #tpu.memory_space<vmem>>) attributes {dimension_semantics = [#tpu.dimension_semantics<parallel>, #tpu.dimension_semantics<parallel>], iteration_bounds = array<i64: 2, 1>, scalar_prefetch = 0 : i64, scratch_operands = 0 : i64, tpu.core_type = #tpu.core_type<tc>, window_params = [{transform_indices = @transform_0, window_bounds = array<i64: 152, 40>}, {pipeline_mode = #tpu.pipeline_mode<synchronous>, transform_indices = @transform_1, window_bounds = array<i64: 40, 1024>}, {transform_indices = @transform_2, window_bounds = array<i64: 152, 1024>}]} {
    %c1024_i32 = arith.constant 1024 : i32
    %0 = arith.muli %arg1, %c1024_i32 : i32
    %1 = tpu.assume_multiple %0, 128 : i32
    %c0 = arith.constant 0 : index
    %2 = arith.index_cast %1 : i32 to index
    %3 = vector.load %arg3[%c0, %2] : memref<40x1024xf32, #tpu.memory_space<vmem>>, vector<40x1024xf32>
    %c0_0 = arith.constant 0 : index
    %c0_1 = arith.constant 0 : index
    %4 = vector.load %arg2[%c0_0, %c0_1] : memref<152x40xf32, #tpu.memory_space<vmem>>, vector<152x40xf32>
    %cst = arith.constant dense<0.000000e+00> : vector<152x1024xf32>
    %5 = tpu.matmul %4, %3, %cst {dimension_numbers = #tpu.dot_dimension_numbers<[1], [0], [0], [1], [0, 0, 1, 1], [], []>} : vector<152x40xf32>, vector<40x1024xf32>, vector<152x1024xf32> -> vector<152x1024xf32>
    %c0_2 = arith.constant 0 : index
    %c0_3 = arith.constant 0 : index
    %6 = vector.load %arg4[%c0_2, %c0_3] : memref<152x1024xf32, #tpu.memory_space<vmem>>, vector<152x1024xf32>
    tpu.vector_store %arg4[%c0_2, %c0_3], %5 {strides = array<i32>} : memref<152x1024xf32, #tpu.memory_space<vmem>>, vector<152x1024xf32>,
    return
  }
  func.func @transform_0(%arg0: i32, %arg1: i32) -> (i32, i32) {
    %c0_i32 = arith.constant 0 : i32
    %c0_i32_0 = arith.constant 0 : i32
    return %arg0, %c0_i32 : i32, i32
  }
  func.func @transform_1(%arg0: i32, %arg1: i32) -> (i32, i32) {
    %c0_i32 = arith.constant 0 : i32
    %c0_i32_0 = arith.constant 0 : i32
    %c0_i32_1 = arith.constant 0 : i32
    return %c0_i32, %c0_i32_0 : i32, i32
  }
  func.func @transform_2(%arg0: i32, %arg1: i32) -> (i32, i32) {
    %c0_i32 = arith.constant 0 : i32
    return %arg0, %arg1 : i32, i32
  }
}

</mosaic_0001>

<bundles_post_ra>
// kernel: tpu_custom_call.1
= control target key start
LH: loop header
LB: loop body
LE: loop exit
PB: predicated region body
PF: predicated region fallthrough
CT: control target
= control target key end

     0   :  { %7 = vsyncpa [#allocation3], 0  ;;  %s2145_s0 = inlined_call_operand.vmem [shape: f32[304,40], index: 0, kind: input, shape index: {}]   ;;  %s2146_s1 = inlined_call_operand.hbm [shape: f32[40,1024], index: 1, kind: input, shape index: {}]   ;;  %s2147_s2 = inlined_call_operand.hbm [shape: f32[304,1024], index: 2, kind: output, shape index: {}]  }
   0x1   :  { %8 = vsyncpa [#allocation4], 0 }
   0x2   :  { %10 = vsyncpa [#allocation4 + $0x1], 0  ;;  %s1562_s9 = smov 0   ;;  %s1564_s10 = smov 0  }
   0x3   :  { %s1566_s11 = smov 0   ;;  %s1568_s12 = smov 0  }
   0x4   :  { %s1570_s13 = smov 0   ;;  %s1572_s14 = smov 0  }
   0x5 LB: > { %s1269_s15 = sadd.s32 4294967295, %s1538_s14   ;;  %s1270_s16 = sadd.s32 4294967294, %s1538_s14   ;;  %s1538_s14 = sphi %s1572_s14, %s16_s14   ;;  %s1534_s13 = sphi %s1570_s13, %s2156_s13   ;;  %s1530_s12 = sphi %s1568_s12, %s2155_s12   ;;  %s1526_s11 = sphi %s1566_s11, %s2154_s11   ;;  %s1522_s10 = sphi %s1564_s10, %s2153_s10   ;;  %s1518_s9 = sphi %s1562_s9, %s2152_s9  }
   0x6   : > { %s28_s17 = sadd.s32 1, %s1534_s13  ;;  %s84_s18 = sadd.s32 1, %s1526_s11 }
   0x7   : > { %p30_p0 = scmp.ge.s32.totalorder %s28_s17, 2  ;;  %p94_p1 = scmp.ne.s32.totalorder %s1526_s11, %s1522_s10 }
   0x8   : > { %p95_p2 = scmp.eq.s32.totalorder %s1269_s15, 1  ;;  %p100_p3 = scmp.ne.s32.totalorder %s1522_s10, %s1518_s9 }
   0x9   : > { %s2158_s17 = smov (%p30_p0, %s28_s17), 0  ;;  %p101_p5 = scmp.eq.s32.totalorder %s1270_s16, 1 }
   0xa   : > { %p1602_p4 = por %p95_p2, %p94_p1  ;;  %s79_s20 = ssub.s32 %s1534_s13, %s2158_s17 }
   0xb   : > { %p1271_p6 = scmp.ge.s32.totalorder %s1538_s14, 1  ;;  %p82_p7 = scmp.eq.s32.totalorder %s79_s20, 0 }
   0xc   : > { %p1609_p8 = por %p101_p5, %p100_p3  ;;  %p108_p9 = scmp.lt.s32.totalorder %s1538_s14, 3 }
   0xd   : > { %s1615_s22 = scalar_select %p82_p7, %s1526_s11, %s84_s18  }
   0xe   : > { %p1617_p10 = pnand %p1271_p6, %p108_p9  ;;  %p1621_p11 = scmp.eq.s32.totalorder %s1269_s15, 0 }
   0xf   : > { %s1540_s25 = smov [#allocation2]  }
  0x10   : > { %p1367_p12 = pneg %p1617_p10  ;;  %s120_s26 = sshll.u32 %s1540_s25, 4  ;;  %s121_s26 = int_to_ptr.vmem [resolvable:$true] %s120_s26 }
  0x11   : > { %s1443_s27 = scalar_lea.vmem %s121_s26, 5120  ;;  %p1451_p5 = scmp.lt.s32.totalorder %s121_s26, %s121_s26 }
  0x12   : > { %p1368_p13 = pnand %p1621_p11, %p1367_p12  ;;  %p1444_p1 = scmp.ne.s32.totalorder %s121_s26, %s1443_s27 }
  0x13   : > { %p1452_p6 = scmp.lt.s32.totalorder %s1443_s27, %s1443_s27 }
  0x14   : > { %p1434_p0 = pneg %p1368_p13 }
  0x15   : > { %p1453_p7 = por %p1452_p6, %p1451_p5 }
  0x16   : > { %p1446_p2 = pnand %p1444_p1, %p1434_p0 }
  0x18   : > { %p1447_p3 = pneg %p1446_p2 }
  0x1a   : > { %p1454_p9 = pnand %p1453_p7, %p1447_p3 }
  0x1c   : > { %1457 = shalt.err (!%p1454_p9)
}
  0x1d   : > { %s1541_s28 = smov 1024   ;;  %s1542_s29 = smov 64  }
  0x1e   : > { %1370 = dma.hbm_to_vmem [thread:$0]  (!%p1368_p13), %s2146_s1, 5120, %s121_s26, [#allocation3], %s1541_s28, %s1541_s28, %s1542_s29  }
  0x1f   : > { %145 = sbr.rel (%p1617_p10) target bundleno = 406 (0x196), region = 28 }
  0x24   : > { %1509 = dma.done.wait (%p1621_p11), [#allocation3], 5120  }
  0x25   : > { %1511 = vsyncadd (%p1621_p11), [#allocation3], 4294962176  ;;  %s167_s4 = smul.u32 19, %s1530_s12  ;;  %v1543_v0 = vmov 0.0   ;;  %v213_v1 = vld [vmem:[#allocation2 + $0x108] sm:$0xff]  ;;  %v215_v2 = vld [vmem:[#allocation2 + $0x118] sm:$0xff] }
  0x26   : > { %361 = vmatprep.mubr.f32.mxu0 %v1543_v0  ;;  %540 = vmatprep.mubr.f32.mxu1 %v1543_v0  ;;  %v212_v3 = vld [vmem:[#allocation2 + $0x100] sm:$0xff]  ;;  %v214_v4 = vld [vmem:[#allocation2 + $0x110] sm:$0xff]  ;;  %v205_v5 = vld [vmem:[#allocation2 + $0xc8] sm:$0xff]  ;;  %vm239_vm0 = vcmask 326656   ;;  %s164_s15 = sand.u32 1, %s1522_s10   ;;  %s1359_s20 = smul.u32 19456, %s1530_s12 }
  0x27   : > { %p168_p12 = scmp.lt.s32.totalorder %s167_s4, 37  ;;  %319 = vmatprep.subr.mxu0 %v213_v1  ;;  %498 = vmatprep.subr.mxu1 %v215_v2  ;;  %v207_v6 = vld [vmem:[#allocation2 + $0xd8] sm:$0xff]  ;;  %v204_v7 = vld [vmem:[#allocation2 + $0xc0] sm:$0xff]  ;;  %v206_v8 = vld [vmem:[#allocation2 + $0xd0] sm:$0xff]  ;;  %s1360_s16 = smul.u32 1216, %s164_s15 }
  0x28   : > { %320 = vmatpush1.msra.mxu0 %v212_v3  ;;  %499 = vmatpush1.msra.mxu1 %v214_v4  ;;  %v197_v9 = vld [vmem:[#allocation2 + $0x88] sm:$0xff]  ;;  %v199_v10 = vld [vmem:[#allocation2 + $0x98] sm:$0xff]  ;;  %v196_v11 = vld [vmem:[#allocation2 + $0x80] sm:$0xff]  ;;  %s2090_s26 = scalar_lea.hbm %s2147_s2, %s1359_s20  ;;  %s2100_s12 = scalar_lea.sflag [#allocation4], %s164_s15 }
  0x29   : > { %s2160_s4 = smov (!%p168_p12, %s167_s4), 37  ;;  %321 = vmatprep.subr.mxu0 %v205_v5  ;;  %500 = vmatprep.subr.mxu1 %v207_v6  ;;  %v198_v12 = vld [vmem:[#allocation2 + $0x90] sm:$0xff]  ;;  %v189_v13 = vld [vmem:[#allocation2 + $0x48] sm:$0xff]  ;;  %v191_v14 = vld [vmem:[#allocation2 + $0x58] sm:$0xff]  ;;  %s1935_s18 = scalar_lea.vmem [#allocation5], %s1360_s16 }
  0x2a   : > { %s1276_s5 = sshll.u32 %s2160_s4, 3  ;;  %322 = vmatpush1.msra.mxu0 %v204_v7  ;;  %501 = vmatpush1.msra.mxu1 %v206_v8  ;;  %v188_v15 = vld [vmem:[#allocation2 + $0x40] sm:$0xff]  ;;  %v190_v16 = vld [vmem:[#allocation2 + $0x50] sm:$0xff]  ;;  %v181_v17 = vld [vmem:[#allocation2 + $0x8] sm:$0xff]  ;;  %s1182_s23 = sshll.u32 %s1935_s18, 4  ;;  %s2092_s23 = int_to_ptr.vmem [resolvable:$true] %s1182_s23 }
  0x2b   : > { %323 = vmatprep.subr.mxu0 %v197_v9  ;;  %502 = vmatprep.subr.mxu1 %v199_v10  ;;  %s1647_s8 = scalar_lea.vmem %s2145_s0, %s1276_s5  ;;  %v183_v18 = vld [vmem:[#allocation2 + $0x18] sm:$0xff]  ;;  %v180_v19 = vld [vmem:[#allocation2] sm:$0xff]  ;;  %v182_v20 = vld [vmem:[#allocation2 + $0x10] sm:$0xff]  ;;  %s1458_s27 = scalar_lea.vmem %s2092_s23, 19456 }
  0x2c   : > { %324 = vmatpush1.msra.mxu0 %v196_v11  ;;  %503 = vmatpush1.msra.mxu1 %v198_v12  ;;  %v1650_v21 = vld [vmem:[%s1647_s8] sm:$0xff]  ;;  %v217_v22 = vld [vmem:[#allocation2 + $0x128] sm:$0xff]  ;;  %v219_v23 = vld [vmem:[#allocation2 + $0x138] sm:$0xff]  ;;  %p1459_p10 = scmp.ne.s32.totalorder %s2092_s23, %s1458_s27  ;;  %s1544_s28 = smov [#allocation5]  }
  0x2d   : > { %325 = vmatprep.subr.mxu0 %v189_v13  ;;  %504 = vmatprep.subr.mxu1 %v191_v14  ;;  %v216_v24 = vld [vmem:[#allocation2 + $0x120] sm:$0xff]  ;;  %v218_v25 = vld [vmem:[#allocation2 + $0x130] sm:$0xff]  ;;  %v1657_v26 = vld [vmem:[%s1647_s8 + $0x8] sm:$0xff]  ;;  %s1462_s29 = sshll.u32 %s1544_s28, 4  ;;  %s1463_s29 = int_to_ptr.vmem [resolvable:$false] %s1462_s29 }
  0x2e   : > { %326 = vmatpush1.msra.mxu0 %v188_v15  ;;  %505 = vmatpush1.msra.mxu1 %v190_v16  ;;  %v209_v27 = vld [vmem:[#allocation2 + $0xe8] sm:$0xff]  ;;  %v211_v28 = vld [vmem:[#allocation2 + $0xf8] sm:$0xff]  ;;  %v208_v29 = vld [vmem:[#allocation2 + $0xe0] sm:$0xff]  ;;  %p1460_p11 = pnand %p1459_p10, %p1602_p4  ;;  %s1464_s30 = scalar_lea.vmem %s1463_s29, 38912 }
  0x2f   : > { %327 = vmatprep.subr.mxu0 %v181_v17  ;;  %506 = vmatprep.subr.mxu1 %v183_v18  ;;  %v210_v30 = vld [vmem:[#allocation2 + $0xf0] sm:$0xff]  ;;  %v201_v32 = vld [vmem:[#allocation2 + $0xa8] sm:$0xff]  ;;  %v203_v33 = vld [vmem:[#allocation2 + $0xb8] sm:$0xff]  ;;  %p1465_p0 = scmp.lt.s32.totalorder %s2092_s23, %s1463_s29  ;;  %p1466_p1 = scmp.lt.s32.totalorder %s1464_s30, %s1458_s27 }
  0x30   : > { %328 = vmatpush1.msra.mxu0 %v180_v19  ;;  %507 = vmatpush1.msra.mxu1 %v182_v20  ;;  %v1668_v31 = vld [vmem:[%s1647_s8 + $0x10] sm:$0xff]  ;;  %v200_v34 = vld [vmem:[#allocation2 + $0xa0] sm:$0xff]  ;;  %v1677_v36 = vld [vmem:[%s1647_s8 + $0x18] sm:$0xff]  ;;  %p1461_p13 = pneg %p1460_p11 }
  0x31   : > { %1277 = vmatmul.mubr.msk.f32.vlgmr.msra.gmra.mxu0 %vm239_vm0, %v1650_v21  ;;  %1296 = vmatmul.mubr.msk.f32.vlgmr.msra.gmra.mxu1 %vm239_vm0, %v1650_v21  ;;  %v202_v35 = vld [vmem:[#allocation2 + $0xb0] sm:$0xff]  ;;  %v193_v37 = vld [vmem:[#allocation2 + $0x68] sm:$0xff]  ;;  %v195_v38 = vld [vmem:[#allocation2 + $0x78] sm:$0xff]  ;;  %p1467_p2 = por %p1466_p1, %p1465_p0 }
  0x32   : > { %677 = vmatprep.subr.mxu0 %v217_v22  ;;  %856 = vmatprep.subr.mxu1 %v219_v23  ;;  %v192_v39 = vld [vmem:[#allocation2 + $0x60] sm:$0xff]  ;;  %v194_v40 = vld [vmem:[#allocation2 + $0x70] sm:$0xff]  ;;  %v185_v42 = vld [vmem:[#allocation2 + $0x28] sm:$0xff] }
  0x33   : > { %678 = vmatpush1.msra.mxu0 %v216_v24  ;;  %857 = vmatpush1.msra.mxu1 %v218_v25  ;;  %v1686_v41 = vld [vmem:[%s1647_s8 + $0x20] sm:$0xff]  ;;  %v187_v43 = vld [vmem:[#allocation2 + $0x38] sm:$0xff]  ;;  %v186_v45 = vld [vmem:[#allocation2 + $0x30] sm:$0xff]  ;;  %p1468_p3 = pnand %p1467_p2, %p1461_p13 }
  0x34   : > { %367 = vmatprep.mubr.f32.mxu0 %v1543_v0  ;;  %546 = vmatprep.mubr.f32.mxu1 %v1543_v0  ;;  %v184_v44 = vld [vmem:[#allocation2 + $0x20] sm:$0xff]  ;;  %v1695_v46 = vld [vmem:[%s1647_s8 + $0x28] sm:$0xff]  ;;  %v1704_v47 = vld [vmem:[%s1647_s8 + $0x30] sm:$0xff] }
  0x35   : > { %1278 = vmatmul.mubr.msk.f32.gmra.mxu0 %vm239_vm0, %v1657_v26  ;;  %1297 = vmatmul.mubr.msk.f32.gmra.mxu1 %vm239_vm0, %v1657_v26  ;;  %v1713_v48 = vld [vmem:[%s1647_s8 + $0x38] sm:$0xff]  ;;  %v1722_v49 = vld [vmem:[%s1647_s8 + $0x40] sm:$0xff]  ;;  %v1731_v50 = vld [vmem:[%s1647_s8 + $0x48] sm:$0xff] }
  0x36   : > { %373 = vmatprep.mubr.f32.mxu0 %v1543_v0  ;;  %552 = vmatprep.mubr.f32.mxu1 %v1543_v0  ;;  %v1740_v51 = vld [vmem:[%s1647_s8 + $0x50] sm:$0xff]  ;;  %v1749_v52 = vld [vmem:[%s1647_s8 + $0x58] sm:$0xff]  ;;  %v1758_v53 = vld [vmem:[%s1647_s8 + $0x60] sm:$0xff] }
  0x37   : > { %679 = vmatprep.subr.mxu0 %v209_v27  ;;  %858 = vmatprep.subr.mxu1 %v211_v28  ;;  %v1767_v54 = vld [vmem:[%s1647_s8 + $0x68] sm:$0xff]  ;;  %v1776_v55 = vld [vmem:[%s1647_s8 + $0x70] sm:$0xff]  ;;  %v1785_v56 = vld [vmem:[%s1647_s8 + $0x78] sm:$0xff] }
  0x38   : > { %680 = vmatpush1.msra.mxu0 %v208_v29  ;;  %859 = vmatpush1.msra.mxu1 %v210_v30  ;;  %v1794_v57 = vld [vmem:[%s1647_s8 + $0x80] sm:$0xff]  ;;  %v1803_v58 = vld [vmem:[%s1647_s8 + $0x88] sm:$0xff]  ;;  %v1812_v59 = vld [vmem:[%s1647_s8 + $0x90] sm:$0xff] }
  0x39   : > { %1279 = vmatmul.mubr.msk.f32.gmra.mxu0 %vm239_vm0, %v1668_v31  ;;  %1298 = vmatmul.mubr.msk.f32.gmra.mxu1 %vm239_vm0, %v1668_v31 }
  0x3a   : > { %379 = vmatprep.mubr.f32.mxu0 %v1543_v0  ;;  %558 = vmatprep.mubr.f32.mxu1 %v1543_v0 }
  0x3b   : > { %681 = vmatprep.subr.mxu0 %v201_v32  ;;  %860 = vmatprep.subr.mxu1 %v203_v33 }
  0x3c   : > { %682 = vmatpush1.msra.mxu0 %v200_v34  ;;  %861 = vmatpush1.msra.mxu1 %v202_v35 }
  0x3d   : > { %1280 = vmatmul.mubr.msk.f32.gmra.mxu0 %vm239_vm0, %v1677_v36  ;;  %1299 = vmatmul.mubr.msk.f32.gmra.mxu1 %vm239_vm0, %v1677_v36 }
  0x3e   : > { %385 = vmatprep.mubr.f32.mxu0 %v1543_v0  ;;  %564 = vmatprep.mubr.f32.mxu1 %v1543_v0 }
  0x3f   : > { %683 = vmatprep.subr.mxu0 %v193_v37  ;;  %862 = vmatprep.subr.mxu1 %v195_v38 }
  0x40   : > { %684 = vmatpush1.msra.mxu0 %v192_v39  ;;  %863 = vmatpush1.msra.mxu1 %v194_v40 }
  0x41   : > { %1281 = vmatmul.mubr.msk.f32.gmra.mxu0 %vm239_vm0, %v1686_v41  ;;  %1300 = vmatmul.mubr.msk.f32.gmra.mxu1 %vm239_vm0, %v1686_v41 }
  0x42   : > { %391 = vmatprep.mubr.f32.mxu0 %v1543_v0  ;;  %570 = vmatprep.mubr.f32.mxu1 %v1543_v0 }
  0x43   : > { %685 = vmatprep.subr.mxu0 %v185_v42  ;;  %864 = vmatprep.subr.mxu1 %v187_v43 }
  0x44   : > { %686 = vmatpush1.msra.mxu0 %v184_v44  ;;  %865 = vmatpush1.msra.mxu1 %v186_v45 }
  0x45   : > { %1282 = vmatmul.mubr.msk.f32.gmra.mxu0 %vm239_vm0, %v1695_v46  ;;  %1301 = vmatmul.mubr.msk.f32.gmra.mxu1 %vm239_vm0, %v1695_v46 }
  0x46   : > { %397 = vmatprep.mubr.f32.mxu0 %v1543_v0  ;;  %576 = vmatprep.mubr.f32.mxu1 %v1543_v0 }
  0x49   : > { %1283 = vmatmul.mubr.msk.f32.gmra.mxu0 %vm239_vm0, %v1704_v47  ;;  %1302 = vmatmul.mubr.msk.f32.gmra.mxu1 %vm239_vm0, %v1704_v47 }
  0x4a   : > { %403 = vmatprep.mubr.f32.mxu0 %v1543_v0  ;;  %582 = vmatprep.mubr.f32.mxu1 %v1543_v0 }
  0x4d   : > { %1284 = vmatmul.mubr.msk.f32.gmra.mxu0 %vm239_vm0, %v1713_v48  ;;  %1303 = vmatmul.mubr.msk.f32.gmra.mxu1 %vm239_vm0, %v1713_v48 }
  0x4e   : > { %409 = vmatprep.mubr.f32.mxu0 %v1543_v0  ;;  %588 = vmatprep.mubr.f32.mxu1 %v1543_v0 }
  0x51   : > { %1285 = vmatmul.mubr.msk.f32.gmra.mxu0 %vm239_vm0, %v1722_v49  ;;  %1304 = vmatmul.mubr.msk.f32.gmra.mxu1 %vm239_vm0, %v1722_v49 }
  0x52   : > { %415 = vmatprep.mubr.f32.mxu0 %v1543_v0  ;;  %594 = vmatprep.mubr.f32.mxu1 %v1543_v0 }
  0x55   : > { %1286 = vmatmul.mubr.msk.f32.gmra.mxu0 %vm239_vm0, %v1731_v50  ;;  %1305 = vmatmul.mubr.msk.f32.gmra.mxu1 %vm239_vm0, %v1731_v50 }
  0x56   : > { %421 = vmatprep.mubr.f32.mxu0 %v1543_v0  ;;  %600 = vmatprep.mubr.f32.mxu1 %v1543_v0 }
  0x59   : > { %1287 = vmatmul.mubr.msk.f32.gmra.mxu0 %vm239_vm0, %v1740_v51  ;;  %1306 = vmatmul.mubr.msk.f32.gmra.mxu1 %vm239_vm0, %v1740_v51 }
  0x5a   : > { %427 = vmatprep.mubr.f32.mxu0 %v1543_v0  ;;  %606 = vmatprep.mubr.f32.mxu1 %v1543_v0 }
  0x5d   : > { %1288 = vmatmul.mubr.msk.f32.gmra.mxu0 %vm239_vm0, %v1749_v52  ;;  %1307 = vmatmul.mubr.msk.f32.gmra.mxu1 %vm239_vm0, %v1749_v52 }
  0x5e   : > { %433 = vmatprep.mubr.f32.mxu0 %v1543_v0  ;;  %612 = vmatprep.mubr.f32.mxu1 %v1543_v0 }
  0x61   : > { %1289 = vmatmul.mubr.msk.f32.gmra.mxu0 %vm239_vm0, %v1758_v53  ;;  %1308 = vmatmul.mubr.msk.f32.gmra.mxu1 %vm239_vm0, %v1758_v53 }
  0x62   : > { %439 = vmatprep.mubr.f32.mxu0 %v1543_v0  ;;  %618 = vmatprep.mubr.f32.mxu1 %v1543_v0 }
  0x65   : > { %1290 = vmatmul.mubr.msk.f32.gmra.mxu0 %vm239_vm0, %v1767_v54  ;;  %1309 = vmatmul.mubr.msk.f32.gmra.mxu1 %vm239_vm0, %v1767_v54 }
  0x66   : > { %445 = vmatprep.mubr.f32.mxu0 %v1543_v0  ;;  %624 = vmatprep.mubr.f32.mxu1 %v1543_v0 }
  0x69   : > { %1291 = vmatmul.mubr.msk.f32.gmra.mxu0 %vm239_vm0, %v1776_v55  ;;  %1310 = vmatmul.mubr.msk.f32.gmra.mxu1 %vm239_vm0, %v1776_v55 }
  0x6a   : > { %451 = vmatprep.mubr.f32.mxu0 %v1543_v0  ;;  %630 = vmatprep.mubr.f32.mxu1 %v1543_v0 }
  0x6d   : > { %1292 = vmatmul.mubr.msk.f32.gmra.mxu0 %vm239_vm0, %v1785_v56  ;;  %1311 = vmatmul.mubr.msk.f32.gmra.mxu1 %vm239_vm0, %v1785_v56 }
  0x6e   : > { %457 = vmatprep.mubr.f32.mxu0 %v1543_v0  ;;  %636 = vmatprep.mubr.f32.mxu1 %v1543_v0 }
  0x71   : > { %1293 = vmatmul.mubr.msk.f32.gmra.mxu0 %vm239_vm0, %v1794_v57  ;;  %1312 = vmatmul.mubr.msk.f32.gmra.mxu1 %vm239_vm0, %v1794_v57 }
  0x72   : > { %463 = vmatprep.mubr.f32.mxu0 %v1543_v0  ;;  %642 = vmatprep.mubr.f32.mxu1 %v1543_v0 }
  0x75   : > { %1294 = vmatmul.mubr.msk.f32.gmra.mxu0 %vm239_vm0, %v1803_v58  ;;  %1313 = vmatmul.mubr.msk.f32.gmra.mxu1 %vm239_vm0, %v1803_v58 }
  0x76   : > { %469 = vmatprep.mubr.f32.mxu0 %v1543_v0  ;;  %648 = vmatprep.mubr.f32.mxu1 %v1543_v0 }
  0x79   : > { %1295 = vmatmul.mubr.msk.f32.gmra.mxu0 %vm239_vm0, %v1812_v59  ;;  %1314 = vmatmul.mubr.msk.f32.gmra.mxu1 %vm239_vm0, %v1812_v59 }
  0x7a   : > { %719 = vmatprep.mubr.f32.mxu0 %v1543_v0  ;;  %898 = vmatprep.mubr.f32.mxu1 %v1543_v0 }
  0x7d   : > { %1315 = vmatmul.mubr.msk.f32.vlgmr.msra.gmra.mxu0 %vm239_vm0, %v1650_v21  ;;  %1334 = vmatmul.mubr.msk.f32.vlgmr.msra.gmra.mxu1 %vm239_vm0, %v1650_v21 }
  0x7e   : > { %725 = vmatprep.mubr.f32.mxu0 %v1543_v0  ;;  %904 = vmatprep.mubr.f32.mxu1 %v1543_v0 }
  0x81   : > { %1316 = vmatmul.mubr.msk.f32.gmra.mxu0 %vm239_vm0, %v1657_v26  ;;  %1335 = vmatmul.mubr.msk.f32.gmra.mxu1 %vm239_vm0, %v1657_v26 }
  0x82   : > { %731 = vmatprep.mubr.f32.mxu0 %v1543_v0  ;;  %910 = vmatprep.mubr.f32.mxu1 %v1543_v0 }
  0x85   : > { %1317 = vmatmul.mubr.msk.f32.gmra.mxu0 %vm239_vm0, %v1668_v31  ;;  %1336 = vmatmul.mubr.msk.f32.gmra.mxu1 %vm239_vm0, %v1668_v31 }
  0x86   : > { %737 = vmatprep.mubr.f32.mxu0 %v1543_v0  ;;  %916 = vmatprep.mubr.f32.mxu1 %v1543_v0 }
  0x89   : > { %1318 = vmatmul.mubr.msk.f32.gmra.mxu0 %vm239_vm0, %v1677_v36  ;;  %1337 = vmatmul.mubr.msk.f32.gmra.mxu1 %vm239_vm0, %v1677_v36 }
  0x8a   : > { %743 = vmatprep.mubr.f32.mxu0 %v1543_v0  ;;  %922 = vmatprep.mubr.f32.mxu1 %v1543_v0 }
  0x8d   : > { %1319 = vmatmul.mubr.msk.f32.gmra.mxu0 %vm239_vm0, %v1686_v41  ;;  %1338 = vmatmul.mubr.msk.f32.gmra.mxu1 %vm239_vm0, %v1686_v41 }
  0x8e   : > { %749 = vmatprep.mubr.f32.mxu0 %v1543_v0  ;;  %928 = vmatprep.mubr.f32.mxu1 %v1543_v0 }
  0x91   : > { %1320 = vmatmul.mubr.msk.f32.gmra.mxu0 %vm239_vm0, %v1695_v46  ;;  %1339 = vmatmul.mubr.msk.f32.gmra.mxu1 %vm239_vm0, %v1695_v46 }
  0x92   : > { %755 = vmatprep.mubr.f32.mxu0 %v1543_v0  ;;  %934 = vmatprep.mubr.f32.mxu1 %v1543_v0 }
  0x95   : > { %1321 = vmatmul.mubr.msk.f32.gmra.mxu0 %vm239_vm0, %v1704_v47  ;;  %1340 = vmatmul.mubr.msk.f32.gmra.mxu1 %vm239_vm0, %v1704_v47 }
  0x96   : > { %761 = vmatprep.mubr.f32.mxu0 %v1543_v0  ;;  %940 = vmatprep.mubr.f32.mxu1 %v1543_v0 }
  0x99   : > { %1322 = vmatmul.mubr.msk.f32.gmra.mxu0 %vm239_vm0, %v1713_v48  ;;  %1341 = vmatmul.mubr.msk.f32.gmra.mxu1 %vm239_vm0, %v1713_v48 }
  0x9a   : > { %767 = vmatprep.mubr.f32.mxu0 %v1543_v0  ;;  %946 = vmatprep.mubr.f32.mxu1 %v1543_v0 }
  0x9d   : > { %1323 = vmatmul.mubr.msk.f32.gmra.mxu0 %vm239_vm0, %v1722_v49  ;;  %1342 = vmatmul.mubr.msk.f32.gmra.mxu1 %vm239_vm0, %v1722_v49 }
  0x9e   : > { %773 = vmatprep.mubr.f32.mxu0 %v1543_v0  ;;  %952 = vmatprep.mubr.f32.mxu1 %v1543_v0 }
  0xa1   : > { %1324 = vmatmul.mubr.msk.f32.gmra.mxu0 %vm239_vm0, %v1731_v50  ;;  %1343 = vmatmul.mubr.msk.f32.gmra.mxu1 %vm239_vm0, %v1731_v50 }
  0xa2   : > { %779 = vmatprep.mubr.f32.mxu0 %v1543_v0  ;;  %958 = vmatprep.mubr.f32.mxu1 %v1543_v0 }
  0xa5   : > { %1325 = vmatmul.mubr.msk.f32.gmra.mxu0 %vm239_vm0, %v1740_v51  ;;  %1344 = vmatmul.mubr.msk.f32.gmra.mxu1 %vm239_vm0, %v1740_v51 }
  0xa6   : > { %785 = vmatprep.mubr.f32.mxu0 %v1543_v0  ;;  %964 = vmatprep.mubr.f32.mxu1 %v1543_v0 }
  0xa9   : > { %1326 = vmatmul.mubr.msk.f32.gmra.mxu0 %vm239_vm0, %v1749_v52  ;;  %1345 = vmatmul.mubr.msk.f32.gmra.mxu1 %vm239_vm0, %v1749_v52 }
  0xaa   : > { %791 = vmatprep.mubr.f32.mxu0 %v1543_v0  ;;  %970 = vmatprep.mubr.f32.mxu1 %v1543_v0 }
  0xad   : > { %1327 = vmatmul.mubr.msk.f32.gmra.mxu0 %vm239_vm0, %v1758_v53  ;;  %1346 = vmatmul.mubr.msk.f32.gmra.mxu1 %vm239_vm0, %v1758_v53 }
  0xae   : > { %797 = vmatprep.mubr.f32.mxu0 %v1543_v0  ;;  %976 = vmatprep.mubr.f32.mxu1 %v1543_v0 }
  0xb1   : > { %1328 = vmatmul.mubr.msk.f32.gmra.mxu0 %vm239_vm0, %v1767_v54  ;;  %1347 = vmatmul.mubr.msk.f32.gmra.mxu1 %vm239_vm0, %v1767_v54 }
  0xb2   : > { %803 = vmatprep.mubr.f32.mxu0 %v1543_v0  ;;  %982 = vmatprep.mubr.f32.mxu1 %v1543_v0 }
  0xb5   : > { %1329 = vmatmul.mubr.msk.f32.gmra.mxu0 %vm239_vm0, %v1776_v55  ;;  %1348 = vmatmul.mubr.msk.f32.gmra.mxu1 %vm239_vm0, %v1776_v55 }
  0xb6   : > { %809 = vmatprep.mubr.f32.mxu0 %v1543_v0  ;;  %988 = vmatprep.mubr.f32.mxu1 %v1543_v0 }
  0xb9   : > { %1330 = vmatmul.mubr.msk.f32.gmra.mxu0 %vm239_vm0, %v1785_v56  ;;  %1349 = vmatmul.mubr.msk.f32.gmra.mxu1 %vm239_vm0, %v1785_v56 }
  0xba   : > { %815 = vmatprep.mubr.f32.mxu0 %v1543_v0  ;;  %994 = vmatprep.mubr.f32.mxu1 %v1543_v0 }
  0xbd   : > { %1331 = vmatmul.mubr.msk.f32.gmra.mxu0 %vm239_vm0, %v1794_v57  ;;  %1350 = vmatmul.mubr.msk.f32.gmra.mxu1 %vm239_vm0, %v1794_v57 }
  0xbe   : > { %821 = vmatprep.mubr.f32.mxu0 %v1543_v0  ;;  %1000 = vmatprep.mubr.f32.mxu1 %v1543_v0 }
  0xc1   : > { %1332 = vmatmul.mubr.msk.f32.gmra.mxu0 %vm239_vm0, %v1803_v58  ;;  %1351 = vmatmul.mubr.msk.f32.gmra.mxu1 %vm239_vm0, %v1803_v58 }
  0xc2   : > { %827 = vmatprep.mubr.f32.mxu0 %v1543_v0  ;;  %1006 = vmatprep.mubr.f32.mxu1 %v1543_v0 }
  0xc5   : > { %1333 = vmatmul.mubr.msk.f32.gmra.mxu0 %vm239_vm0, %v1812_v59  ;;  %1352 = vmatmul.mubr.msk.f32.gmra.mxu1 %vm239_vm0, %v1812_v59 }
  0xf1   : > { %v363_v60 = vpop.f32.mrf.mxu0  ;;  %v542_v61 = vpop.f32.mrf.mxu1 }
  0xf2   : > { %1013 = vst [vmem:[%s1935_s18] sm:$0xff] %v363_v60  ;;  %1015 = vst [vmem:[%s1935_s18 + $0x10] sm:$0xff] %v542_v61 }
  0xf3   : > { %v365_v62 = vpop.f32.mrf.mxu0  ;;  %v544_v63 = vpop.f32.mrf.mxu1 }
  0xf4   : > { %1014 = vst [vmem:[%s1935_s18 + $0x8] sm:$0xff] %v365_v62  ;;  %1016 = vst [vmem:[%s1935_s18 + $0x18] sm:$0xff] %v544_v63 }
  0xf5   : > { %v369_v0 = vpop.f32.mrf.mxu0  ;;  %v548_v1 = vpop.f32.mrf.mxu1 }
  0xf6   : > { %1021 = vst [vmem:[%s1935_s18 + $0x40] sm:$0xff] %v369_v0  ;;  %1023 = vst [vmem:[%s1935_s18 + $0x50] sm:$0xff] %v548_v1 }
  0xf7   : > { %v371_v2 = vpop.f32.mrf.mxu0  ;;  %v550_v3 = vpop.f32.mrf.mxu1 }
  0xf8   : > { %1022 = vst [vmem:[%s1935_s18 + $0x48] sm:$0xff] %v371_v2  ;;  %1024 = vst [vmem:[%s1935_s18 + $0x58] sm:$0xff] %v550_v3 }
  0xf9   : > { %v375_v4 = vpop.f32.mrf.mxu0  ;;  %v554_v5 = vpop.f32.mrf.mxu1 }
  0xfa   : > { %1029 = vst [vmem:[%s1935_s18 + $0x80] sm:$0xff] %v375_v4  ;;  %1031 = vst [vmem:[%s1935_s18 + $0x90] sm:$0xff] %v554_v5 }
  0xfb   : > { %v377_v6 = vpop.f32.mrf.mxu0  ;;  %v556_v7 = vpop.f32.mrf.mxu1 }
  0xfc   : > { %1030 = vst [vmem:[%s1935_s18 + $0x88] sm:$0xff] %v377_v6  ;;  %1032 = vst [vmem:[%s1935_s18 + $0x98] sm:$0xff] %v556_v7 }
  0xfd   : > { %v381_v8 = vpop.f32.mrf.mxu0  ;;  %v560_v9 = vpop.f32.mrf.mxu1 }
  0xfe   : > { %1037 = vst [vmem:[%s1935_s18 + $0xc0] sm:$0xff] %v381_v8  ;;  %1039 = vst [vmem:[%s1935_s18 + $0xd0] sm:$0xff] %v560_v9 }
  0xff   : > { %v383_v10 = vpop.f32.mrf.mxu0  ;;  %v562_v11 = vpop.f32.mrf.mxu1 }
 0x100   : > { %1038 = vst [vmem:[%s1935_s18 + $0xc8] sm:$0xff] %v383_v10  ;;  %1040 = vst [vmem:[%s1935_s18 + $0xd8] sm:$0xff] %v562_v11 }
 0x101   : > { %v387_v12 = vpop.f32.mrf.mxu0  ;;  %v566_v13 = vpop.f32.mrf.mxu1 }
 0x102   : > { %1045 = vst [vmem:[%s1935_s18 + $0x100] sm:$0xff] %v387_v12  ;;  %1047 = vst [vmem:[%s1935_s18 + $0x110] sm:$0xff] %v566_v13 }
 0x103   : > { %v389_v14 = vpop.f32.mrf.mxu0  ;;  %v568_v15 = vpop.f32.mrf.mxu1 }
 0x104   : > { %1046 = vst [vmem:[%s1935_s18 + $0x108] sm:$0xff] %v389_v14  ;;  %1048 = vst [vmem:[%s1935_s18 + $0x118] sm:$0xff] %v568_v15 }
 0x105   : > { %v393_v16 = vpop.f32.mrf.mxu0  ;;  %v572_v17 = vpop.f32.mrf.mxu1 }
 0x106   : > { %1053 = vst [vmem:[%s1935_s18 + $0x140] sm:$0xff] %v393_v16  ;;  %1055 = vst [vmem:[%s1935_s18 + $0x150] sm:$0xff] %v572_v17 }
 0x107   : > { %v395_v18 = vpop.f32.mrf.mxu0  ;;  %v574_v19 = vpop.f32.mrf.mxu1 }
 0x108   : > { %1054 = vst [vmem:[%s1935_s18 + $0x148] sm:$0xff] %v395_v18  ;;  %1056 = vst [vmem:[%s1935_s18 + $0x158] sm:$0xff] %v574_v19 }
 0x109   : > { %v399_v20 = vpop.f32.mrf.mxu0  ;;  %v578_v21 = vpop.f32.mrf.mxu1 }
 0x10a   : > { %1061 = vst [vmem:[%s1935_s18 + $0x180] sm:$0xff] %v399_v20  ;;  %1063 = vst [vmem:[%s1935_s18 + $0x190] sm:$0xff] %v578_v21 }
 0x10b   : > { %v401_v22 = vpop.f32.mrf.mxu0  ;;  %v580_v23 = vpop.f32.mrf.mxu1 }
 0x10c   : > { %1062 = vst [vmem:[%s1935_s18 + $0x188] sm:$0xff] %v401_v22  ;;  %1064 = vst [vmem:[%s1935_s18 + $0x198] sm:$0xff] %v580_v23 }
 0x10d   : > { %v405_v24 = vpop.f32.mrf.mxu0  ;;  %v584_v25 = vpop.f32.mrf.mxu1 }
 0x10e   : > { %1069 = vst [vmem:[%s1935_s18 + $0x1c0] sm:$0xff] %v405_v24  ;;  %1071 = vst [vmem:[%s1935_s18 + $0x1d0] sm:$0xff] %v584_v25 }
 0x10f   : > { %v407_v26 = vpop.f32.mrf.mxu0  ;;  %v586_v27 = vpop.f32.mrf.mxu1 }
 0x110   : > { %1070 = vst [vmem:[%s1935_s18 + $0x1c8] sm:$0xff] %v407_v26  ;;  %1072 = vst [vmem:[%s1935_s18 + $0x1d8] sm:$0xff] %v586_v27 }
 0x111   : > { %v411_v28 = vpop.f32.mrf.mxu0  ;;  %v590_v29 = vpop.f32.mrf.mxu1 }
 0x112   : > { %1077 = vst [vmem:[%s1935_s18 + $0x200] sm:$0xff] %v411_v28  ;;  %1079 = vst [vmem:[%s1935_s18 + $0x210] sm:$0xff] %v590_v29 }
 0x113   : > { %v413_v30 = vpop.f32.mrf.mxu0  ;;  %v592_v31 = vpop.f32.mrf.mxu1 }
 0x114   : > { %1078 = vst [vmem:[%s1935_s18 + $0x208] sm:$0xff] %v413_v30  ;;  %1080 = vst [vmem:[%s1935_s18 + $0x218] sm:$0xff] %v592_v31 }
 0x115   : > { %v417_v32 = vpop.f32.mrf.mxu0  ;;  %v596_v33 = vpop.f32.mrf.mxu1 }
 0x116   : > { %1085 = vst [vmem:[%s1935_s18 + $0x240] sm:$0xff] %v417_v32  ;;  %1087 = vst [vmem:[%s1935_s18 + $0x250] sm:$0xff] %v596_v33 }
 0x117   : > { %v419_v34 = vpop.f32.mrf.mxu0  ;;  %v598_v35 = vpop.f32.mrf.mxu1 }
 0x118   : > { %1086 = vst [vmem:[%s1935_s18 + $0x248] sm:$0xff] %v419_v34  ;;  %1088 = vst [vmem:[%s1935_s18 + $0x258] sm:$0xff] %v598_v35 }
 0x119   : > { %v423_v36 = vpop.f32.mrf.mxu0  ;;  %v602_v37 = vpop.f32.mrf.mxu1 }
 0x11a   : > { %1093 = vst [vmem:[%s1935_s18 + $0x280] sm:$0xff] %v423_v36  ;;  %1095 = vst [vmem:[%s1935_s18 + $0x290] sm:$0xff] %v602_v37 }
 0x11b   : > { %v425_v38 = vpop.f32.mrf.mxu0  ;;  %v604_v39 = vpop.f32.mrf.mxu1 }
 0x11c   : > { %1094 = vst [vmem:[%s1935_s18 + $0x288] sm:$0xff] %v425_v38  ;;  %1096 = vst [vmem:[%s1935_s18 + $0x298] sm:$0xff] %v604_v39 }
 0x11d   : > { %v429_v40 = vpop.f32.mrf.mxu0  ;;  %v608_v41 = vpop.f32.mrf.mxu1 }
 0x11e   : > { %1101 = vst [vmem:[%s1935_s18 + $0x2c0] sm:$0xff] %v429_v40  ;;  %1103 = vst [vmem:[%s1935_s18 + $0x2d0] sm:$0xff] %v608_v41 }
 0x11f   : > { %v431_v42 = vpop.f32.mrf.mxu0  ;;  %v610_v43 = vpop.f32.mrf.mxu1 }
 0x120   : > { %1102 = vst [vmem:[%s1935_s18 + $0x2c8] sm:$0xff] %v431_v42  ;;  %1104 = vst [vmem:[%s1935_s18 + $0x2d8] sm:$0xff] %v610_v43 }
 0x121   : > { %v435_v44 = vpop.f32.mrf.mxu0  ;;  %v614_v45 = vpop.f32.mrf.mxu1 }
 0x122   : > { %1109 = vst [vmem:[%s1935_s18 + $0x300] sm:$0xff] %v435_v44  ;;  %1111 = vst [vmem:[%s1935_s18 + $0x310] sm:$0xff] %v614_v45 }
 0x123   : > { %v437_v46 = vpop.f32.mrf.mxu0  ;;  %v616_v47 = vpop.f32.mrf.mxu1 }
 0x124   : > { %1110 = vst [vmem:[%s1935_s18 + $0x308] sm:$0xff] %v437_v46  ;;  %1112 = vst [vmem:[%s1935_s18 + $0x318] sm:$0xff] %v616_v47 }
 0x125   : > { %v441_v48 = vpop.f32.mrf.mxu0  ;;  %v620_v49 = vpop.f32.mrf.mxu1 }
 0x126   : > { %1117 = vst [vmem:[%s1935_s18 + $0x340] sm:$0xff] %v441_v48  ;;  %1119 = vst [vmem:[%s1935_s18 + $0x350] sm:$0xff] %v620_v49 }
 0x127   : > { %v443_v50 = vpop.f32.mrf.mxu0  ;;  %v622_v51 = vpop.f32.mrf.mxu1 }
 0x128   : > { %1118 = vst [vmem:[%s1935_s18 + $0x348] sm:$0xff] %v443_v50  ;;  %1120 = vst [vmem:[%s1935_s18 + $0x358] sm:$0xff] %v622_v51 }
 0x129   : > { %v447_v52 = vpop.f32.mrf.mxu0  ;;  %v626_v53 = vpop.f32.mrf.mxu1 }
 0x12a   : > { %1125 = vst [vmem:[%s1935_s18 + $0x380] sm:$0xff] %v447_v52  ;;  %1127 = vst [vmem:[%s1935_s18 + $0x390] sm:$0xff] %v626_v53 }
 0x12b   : > { %v449_v54 = vpop.f32.mrf.mxu0  ;;  %v628_v55 = vpop.f32.mrf.mxu1 }
 0x12c   : > { %1126 = vst [vmem:[%s1935_s18 + $0x388] sm:$0xff] %v449_v54  ;;  %1128 = vst [vmem:[%s1935_s18 + $0x398] sm:$0xff] %v628_v55 }
 0x12d   : > { %v453_v56 = vpop.f32.mrf.mxu0  ;;  %v632_v57 = vpop.f32.mrf.mxu1 }
 0x12e   : > { %1133 = vst [vmem:[%s1935_s18 + $0x3c0] sm:$0xff] %v453_v56  ;;  %1135 = vst [vmem:[%s1935_s18 + $0x3d0] sm:$0xff] %v632_v57 }
 0x12f   : > { %v455_v58 = vpop.f32.mrf.mxu0  ;;  %v634_v59 = vpop.f32.mrf.mxu1 }
 0x130   : > { %1134 = vst [vmem:[%s1935_s18 + $0x3c8] sm:$0xff] %v455_v58  ;;  %1136 = vst [vmem:[%s1935_s18 + $0x3d8] sm:$0xff] %v634_v59 }
 0x131   : > { %v459_v60 = vpop.f32.mrf.mxu0  ;;  %v638_v61 = vpop.f32.mrf.mxu1 }
 0x132   : > { %1141 = vst [vmem:[%s1935_s18 + $0x400] sm:$0xff] %v459_v60  ;;  %1143 = vst [vmem:[%s1935_s18 + $0x410] sm:$0xff] %v638_v61 }
 0x133   : > { %v461_v62 = vpop.f32.mrf.mxu0  ;;  %v640_v63 = vpop.f32.mrf.mxu1 }
 0x134   : > { %1142 = vst [vmem:[%s1935_s18 + $0x408] sm:$0xff] %v461_v62  ;;  %1144 = vst [vmem:[%s1935_s18 + $0x418] sm:$0xff] %v640_v63 }
 0x135   : > { %v465_v0 = vpop.f32.mrf.mxu0  ;;  %v644_v1 = vpop.f32.mrf.mxu1 }
 0x136   : > { %1149 = vst [vmem:[%s1935_s18 + $0x440] sm:$0xff] %v465_v0  ;;  %1151 = vst [vmem:[%s1935_s18 + $0x450] sm:$0xff] %v644_v1 }
 0x137   : > { %v467_v2 = vpop.f32.mrf.mxu0  ;;  %v646_v3 = vpop.f32.mrf.mxu1 }
 0x138   : > { %1150 = vst [vmem:[%s1935_s18 + $0x448] sm:$0xff] %v467_v2  ;;  %1152 = vst [vmem:[%s1935_s18 + $0x458] sm:$0xff] %v646_v3 }
 0x139   : > { %v471_v4 = vpop.f32.mrf.mxu0  ;;  %v650_v5 = vpop.f32.mrf.mxu1 }
 0x13a   : > { %1157 = vst [vmem:[%s1935_s18 + $0x480] sm:$0xff] %v471_v4  ;;  %1159 = vst [vmem:[%s1935_s18 + $0x490] sm:$0xff] %v650_v5 }
 0x13b   : > { %v473_v6 = vpop.f32.mrf.mxu0  ;;  %v652_v7 = vpop.f32.mrf.mxu1 }
 0x13c   : > { %1158 = vst [vmem:[%s1935_s18 + $0x488] sm:$0xff] %v473_v6  ;;  %1160 = vst [vmem:[%s1935_s18 + $0x498] sm:$0xff] %v652_v7 }
 0x13d   : > { %v721_v8 = vpop.f32.mrf.mxu0  ;;  %v900_v9 = vpop.f32.mrf.mxu1 }
 0x13e   : > { %1017 = vst [vmem:[%s1935_s18 + $0x20] sm:$0xff] %v721_v8  ;;  %1019 = vst [vmem:[%s1935_s18 + $0x30] sm:$0xff] %v900_v9 }
 0x13f   : > { %v723_v10 = vpop.f32.mrf.mxu0  ;;  %v902_v11 = vpop.f32.mrf.mxu1 }
 0x140   : > { %1018 = vst [vmem:[%s1935_s18 + $0x28] sm:$0xff] %v723_v10  ;;  %1020 = vst [vmem:[%s1935_s18 + $0x38] sm:$0xff] %v902_v11 }
 0x141   : > { %v727_v12 = vpop.f32.mrf.mxu0  ;;  %v906_v13 = vpop.f32.mrf.mxu1 }
 0x142   : > { %1025 = vst [vmem:[%s1935_s18 + $0x60] sm:$0xff] %v727_v12  ;;  %1027 = vst [vmem:[%s1935_s18 + $0x70] sm:$0xff] %v906_v13 }
 0x143   : > { %v729_v14 = vpop.f32.mrf.mxu0  ;;  %v908_v15 = vpop.f32.mrf.mxu1 }
 0x144   : > { %1026 = vst [vmem:[%s1935_s18 + $0x68] sm:$0xff] %v729_v14  ;;  %1028 = vst [vmem:[%s1935_s18 + $0x78] sm:$0xff] %v908_v15 }
 0x145   : > { %v733_v16 = vpop.f32.mrf.mxu0  ;;  %v912_v17 = vpop.f32.mrf.mxu1 }
 0x146   : > { %1033 = vst [vmem:[%s1935_s18 + $0xa0] sm:$0xff] %v733_v16  ;;  %1035 = vst [vmem:[%s1935_s18 + $0xb0] sm:$0xff] %v912_v17 }
 0x147   : > { %v735_v18 = vpop.f32.mrf.mxu0  ;;  %v914_v19 = vpop.f32.mrf.mxu1 }
 0x148   : > { %1034 = vst [vmem:[%s1935_s18 + $0xa8] sm:$0xff] %v735_v18  ;;  %1036 = vst [vmem:[%s1935_s18 + $0xb8] sm:$0xff] %v914_v19 }
 0x149   : > { %v739_v20 = vpop.f32.mrf.mxu0  ;;  %v918_v21 = vpop.f32.mrf.mxu1 }
 0x14a   : > { %1041 = vst [vmem:[%s1935_s18 + $0xe0] sm:$0xff] %v739_v20  ;;  %1043 = vst [vmem:[%s1935_s18 + $0xf0] sm:$0xff] %v918_v21 }
 0x14b   : > { %v741_v22 = vpop.f32.mrf.mxu0  ;;  %v920_v23 = vpop.f32.mrf.mxu1 }
 0x14c   : > { %1042 = vst [vmem:[%s1935_s18 + $0xe8] sm:$0xff] %v741_v22  ;;  %1044 = vst [vmem:[%s1935_s18 + $0xf8] sm:$0xff] %v920_v23 }
 0x14d   : > { %v745_v24 = vpop.f32.mrf.mxu0  ;;  %v924_v25 = vpop.f32.mrf.mxu1 }
 0x14e   : > { %1049 = vst [vmem:[%s1935_s18 + $0x120] sm:$0xff] %v745_v24  ;;  %1051 = vst [vmem:[%s1935_s18 + $0x130] sm:$0xff] %v924_v25 }
 0x14f   : > { %v747_v26 = vpop.f32.mrf.mxu0  ;;  %v926_v27 = vpop.f32.mrf.mxu1 }
 0x150   : > { %1050 = vst [vmem:[%s1935_s18 + $0x128] sm:$0xff] %v747_v26  ;;  %1052 = vst [vmem:[%s1935_s18 + $0x138] sm:$0xff] %v926_v27 }
 0x151   : > { %v751_v28 = vpop.f32.mrf.mxu0  ;;  %v930_v29 = vpop.f32.mrf.mxu1 }
 0x152   : > { %1057 = vst [vmem:[%s1935_s18 + $0x160] sm:$0xff] %v751_v28  ;;  %1059 = vst [vmem:[%s1935_s18 + $0x170] sm:$0xff] %v930_v29 }
 0x153   : > { %v753_v30 = vpop.f32.mrf.mxu0  ;;  %v932_v31 = vpop.f32.mrf.mxu1 }
 0x154   : > { %1058 = vst [vmem:[%s1935_s18 + $0x168] sm:$0xff] %v753_v30  ;;  %1060 = vst [vmem:[%s1935_s18 + $0x178] sm:$0xff] %v932_v31 }
 0x155   : > { %v757_v32 = vpop.f32.mrf.mxu0  ;;  %v936_v33 = vpop.f32.mrf.mxu1 }
 0x156   : > { %1065 = vst [vmem:[%s1935_s18 + $0x1a0] sm:$0xff] %v757_v32  ;;  %1067 = vst [vmem:[%s1935_s18 + $0x1b0] sm:$0xff] %v936_v33 }
 0x157   : > { %v759_v34 = vpop.f32.mrf.mxu0  ;;  %v938_v35 = vpop.f32.mrf.mxu1 }
 0x158   : > { %1066 = vst [vmem:[%s1935_s18 + $0x1a8] sm:$0xff] %v759_v34  ;;  %1068 = vst [vmem:[%s1935_s18 + $0x1b8] sm:$0xff] %v938_v35 }
 0x159   : > { %v763_v36 = vpop.f32.mrf.mxu0  ;;  %v942_v37 = vpop.f32.mrf.mxu1 }
 0x15a   : > { %1073 = vst [vmem:[%s1935_s18 + $0x1e0] sm:$0xff] %v763_v36  ;;  %1075 = vst [vmem:[%s1935_s18 + $0x1f0] sm:$0xff] %v942_v37 }
 0x15b   : > { %v765_v38 = vpop.f32.mrf.mxu0  ;;  %v944_v39 = vpop.f32.mrf.mxu1 }
 0x15c   : > { %1074 = vst [vmem:[%s1935_s18 + $0x1e8] sm:$0xff] %v765_v38  ;;  %1076 = vst [vmem:[%s1935_s18 + $0x1f8] sm:$0xff] %v944_v39 }
 0x15d   : > { %v769_v40 = vpop.f32.mrf.mxu0  ;;  %v948_v41 = vpop.f32.mrf.mxu1 }
 0x15e   : > { %1081 = vst [vmem:[%s1935_s18 + $0x220] sm:$0xff] %v769_v40  ;;  %1083 = vst [vmem:[%s1935_s18 + $0x230] sm:$0xff] %v948_v41 }
 0x15f   : > { %v771_v42 = vpop.f32.mrf.mxu0  ;;  %v950_v43 = vpop.f32.mrf.mxu1 }
 0x160   : > { %1082 = vst [vmem:[%s1935_s18 + $0x228] sm:$0xff] %v771_v42  ;;  %1084 = vst [vmem:[%s1935_s18 + $0x238] sm:$0xff] %v950_v43 }
 0x161   : > { %v775_v44 = vpop.f32.mrf.mxu0  ;;  %v954_v45 = vpop.f32.mrf.mxu1 }
 0x162   : > { %1089 = vst [vmem:[%s1935_s18 + $0x260] sm:$0xff] %v775_v44  ;;  %1091 = vst [vmem:[%s1935_s18 + $0x270] sm:$0xff] %v954_v45 }
 0x163   : > { %v777_v46 = vpop.f32.mrf.mxu0  ;;  %v956_v47 = vpop.f32.mrf.mxu1 }
 0x164   : > { %1090 = vst [vmem:[%s1935_s18 + $0x268] sm:$0xff] %v777_v46  ;;  %1092 = vst [vmem:[%s1935_s18 + $0x278] sm:$0xff] %v956_v47 }
 0x165   : > { %v781_v48 = vpop.f32.mrf.mxu0  ;;  %v960_v49 = vpop.f32.mrf.mxu1 }
 0x166   : > { %1097 = vst [vmem:[%s1935_s18 + $0x2a0] sm:$0xff] %v781_v48  ;;  %1099 = vst [vmem:[%s1935_s18 + $0x2b0] sm:$0xff] %v960_v49 }
 0x167   : > { %v783_v50 = vpop.f32.mrf.mxu0  ;;  %v962_v51 = vpop.f32.mrf.mxu1 }
 0x168   : > { %1098 = vst [vmem:[%s1935_s18 + $0x2a8] sm:$0xff] %v783_v50  ;;  %1100 = vst [vmem:[%s1935_s18 + $0x2b8] sm:$0xff] %v962_v51 }
 0x169   : > { %v787_v52 = vpop.f32.mrf.mxu0  ;;  %v966_v53 = vpop.f32.mrf.mxu1 }
 0x16a   : > { %1105 = vst [vmem:[%s1935_s18 + $0x2e0] sm:$0xff] %v787_v52  ;;  %1107 = vst [vmem:[%s1935_s18 + $0x2f0] sm:$0xff] %v966_v53 }
 0x16b   : > { %v789_v54 = vpop.f32.mrf.mxu0  ;;  %v968_v55 = vpop.f32.mrf.mxu1 }
 0x16c   : > { %1106 = vst [vmem:[%s1935_s18 + $0x2e8] sm:$0xff] %v789_v54  ;;  %1108 = vst [vmem:[%s1935_s18 + $0x2f8] sm:$0xff] %v968_v55 }
 0x16d   : > { %v793_v56 = vpop.f32.mrf.mxu0  ;;  %v972_v57 = vpop.f32.mrf.mxu1 }
 0x16e   : > { %1113 = vst [vmem:[%s1935_s18 + $0x320] sm:$0xff] %v793_v56  ;;  %1115 = vst [vmem:[%s1935_s18 + $0x330] sm:$0xff] %v972_v57 }
 0x16f   : > { %v795_v58 = vpop.f32.mrf.mxu0  ;;  %v974_v59 = vpop.f32.mrf.mxu1 }
 0x170   : > { %1114 = vst [vmem:[%s1935_s18 + $0x328] sm:$0xff] %v795_v58  ;;  %1116 = vst [vmem:[%s1935_s18 + $0x338] sm:$0xff] %v974_v59 }
 0x171   : > { %v799_v60 = vpop.f32.mrf.mxu0  ;;  %v978_v61 = vpop.f32.mrf.mxu1 }
 0x172   : > { %1121 = vst [vmem:[%s1935_s18 + $0x360] sm:$0xff] %v799_v60  ;;  %1123 = vst [vmem:[%s1935_s18 + $0x370] sm:$0xff] %v978_v61 }
 0x173   : > { %v801_v62 = vpop.f32.mrf.mxu0  ;;  %v980_v63 = vpop.f32.mrf.mxu1 }
 0x174   : > { %1122 = vst [vmem:[%s1935_s18 + $0x368] sm:$0xff] %v801_v62  ;;  %1124 = vst [vmem:[%s1935_s18 + $0x378] sm:$0xff] %v980_v63 }
 0x175   : > { %v805_v0 = vpop.f32.mrf.mxu0  ;;  %v984_v1 = vpop.f32.mrf.mxu1 }
 0x176   : > { %1129 = vst [vmem:[%s1935_s18 + $0x3a0] sm:$0xff] %v805_v0  ;;  %1131 = vst [vmem:[%s1935_s18 + $0x3b0] sm:$0xff] %v984_v1 }
 0x177   : > { %v807_v2 = vpop.f32.mrf.mxu0  ;;  %v986_v3 = vpop.f32.mrf.mxu1 }
 0x178   : > { %1130 = vst [vmem:[%s1935_s18 + $0x3a8] sm:$0xff] %v807_v2  ;;  %1132 = vst [vmem:[%s1935_s18 + $0x3b8] sm:$0xff] %v986_v3 }
 0x179   : > { %v811_v4 = vpop.f32.mrf.mxu0  ;;  %v990_v5 = vpop.f32.mrf.mxu1 }
 0x17a   : > { %1137 = vst [vmem:[%s1935_s18 + $0x3e0] sm:$0xff] %v811_v4  ;;  %1139 = vst [vmem:[%s1935_s18 + $0x3f0] sm:$0xff] %v990_v5 }
 0x17b   : > { %v813_v6 = vpop.f32.mrf.mxu0  ;;  %v992_v7 = vpop.f32.mrf.mxu1 }
 0x17c   : > { %1138 = vst [vmem:[%s1935_s18 + $0x3e8] sm:$0xff] %v813_v6  ;;  %1140 = vst [vmem:[%s1935_s18 + $0x3f8] sm:$0xff] %v992_v7 }
 0x17d   : > { %v817_v8 = vpop.f32.mrf.mxu0  ;;  %v996_v9 = vpop.f32.mrf.mxu1 }
 0x17e   : > { %1145 = vst [vmem:[%s1935_s18 + $0x420] sm:$0xff] %v817_v8  ;;  %1147 = vst [vmem:[%s1935_s18 + $0x430] sm:$0xff] %v996_v9 }
 0x17f   : > { %v819_v10 = vpop.f32.mrf.mxu0  ;;  %v998_v11 = vpop.f32.mrf.mxu1 }
 0x180   : > { %1146 = vst [vmem:[%s1935_s18 + $0x428] sm:$0xff] %v819_v10  ;;  %1148 = vst [vmem:[%s1935_s18 + $0x438] sm:$0xff] %v998_v11 }
 0x181   : > { %v823_v12 = vpop.f32.mrf.mxu0  ;;  %v1002_v13 = vpop.f32.mrf.mxu1 }
 0x182   : > { %1153 = vst [vmem:[%s1935_s18 + $0x460] sm:$0xff] %v823_v12  ;;  %1155 = vst [vmem:[%s1935_s18 + $0x470] sm:$0xff] %v1002_v13 }
 0x183   : > { %v825_v14 = vpop.f32.mrf.mxu0  ;;  %v1004_v15 = vpop.f32.mrf.mxu1 }
 0x184   : > { %1154 = vst [vmem:[%s1935_s18 + $0x468] sm:$0xff] %v825_v14  ;;  %1156 = vst [vmem:[%s1935_s18 + $0x478] sm:$0xff] %v1004_v15 }
 0x185   : > { %v829_v16 = vpop.f32.mrf.mxu0  ;;  %v1008_v17 = vpop.f32.mrf.mxu1 }
 0x186   : > { %1161 = vst [vmem:[%s1935_s18 + $0x4a0] sm:$0xff] %v829_v16  ;;  %1163 = vst [vmem:[%s1935_s18 + $0x4b0] sm:$0xff] %v1008_v17 }
 0x187   : > { %v831_v18 = vpop.f32.mrf.mxu0  ;;  %v1010_v19 = vpop.f32.mrf.mxu1 }
 0x188   : > { %1162 = vst [vmem:[%s1935_s18 + $0x4a8] sm:$0xff] %v831_v18  ;;  %1164 = vst [vmem:[%s1935_s18 + $0x4b8] sm:$0xff] %v1010_v19 }
 0x189   : > { %1471 = shalt.err (!%p1468_p3)
}
 0x18a   : > { %s1472_s3 = scalar_lea.hbm %s2090_s26, 19456  ;;  %s1476_s6 = scalar_lea.hbm %s2147_s2, 38912 }
 0x18b   : > { %p1473_p5 = scmp.ne.s32.totalorder %s2090_s26, %s1472_s3  ;;  %p1477_p9 = scmp.lt.s32.totalorder %s2090_s26, %s2147_s2 }
 0x18c   : > { %p1478_p12 = scmp.lt.s32.totalorder %s1476_s6, %s1472_s3 }
 0x18d   : > { %p1474_p6 = pnand %p1473_p5, %p1602_p4 }
 0x18e   : > { %p1479_p10 = por %p1478_p12, %p1477_p9 }
 0x18f   : > { %p1475_p7 = pneg %p1474_p6 }
 0x191   : > { %p1480_p11 = pnand %p1479_p10, %p1475_p7 }
 0x193   : > { %1483 = shalt.err (!%p1480_p11)
}
 0x194   : > { %s1545_s15 = smov 1024   ;;  %s1546_s16 = smov 64  }
 0x195   : > { %1365 = dma.vmem_to_hbm [thread:$0]  (%p1602_p4), %s2092_s23, 19456, %s2090_s26, %s2100_s12, %s1545_s15, %s1545_s15, %s1546_s16  }
 0x196 PF: > { %p1377_p13 = scmp.ge.s32.totalorder %s1538_s14, 2  ;;  %s1197_s18 = sand.u32 1, %s1518_s9  }
 0x197   : > { %s1198_s20 = scalar_lea.sflag [#allocation4], %s1197_s18 }
 0x198   : > { %p1372_p0 = pnand %p1377_p13, %p1609_p8 }
 0x19a   : > { %p1373_p1 = pneg %p1372_p0 }
 0x19c   : > { %1513 = dma.done.wait (%p1373_p1), %s1198_s20, 19456  }
 0x19d   : > { %1515 = vsyncadd (%p1373_p1), %s1198_s20, 4294947840  ;;  %s16_s14 = sadd.s32 1, %s1538_s14   ;;  %s2152_s9 = smov %s1522_s10 }
 0x19e   : > { %p13_p2 = scmp.ge.s32.totalorder %s16_s14, 4   ;;  %s2153_s10 = smov %s1526_s11 }
 0x19f   : > { %s2154_s11 = smov %s1615_s22  ;;  %s2155_s12 = smov %s1534_s13 }
 0x1a0   : > { %s2156_s13 = smov %s2158_s17  ;;  %15 = sbr.rel (!%p13_p2) target bundleno = 5 (0x5), region = 69 }
 0x1a5   :  { %1203 = vsyncpa [#allocation3], 1 }
 0x1a6   :  { %1205 = vsyncpa [#allocation3 + $0x1], 1 }
 0x1a7   :  { %1206 = vsyncpa [#allocation4], 1 }
 0x1a8   :  { %1208 = vsyncpa [#allocation4 + $0x1], 1 }

</bundles_post_ra>
